<compile_context>
chip_gen: v7x
topology: tpu7x:2x2x1
jax: 0.10.0
libtpu: 0.0.40
codegen_flags: <defaults>
</compile_context>

<pallas_src>
import functools

import jax
import jax.numpy as jnp
from jax import lax
from jax.experimental import pallas as pl
from jax.experimental.pallas import tpu as pltpu


def rnn_kernel(ids_ref, tabp_ref, whh_ref, bias_ref, wout_ref, bout_ref,
               out_ref, hs_ref):
    B, T, C = out_ref.shape
    V, H = tabp_ref.shape
    mm_dtype = whh_ref.dtype           # matmul-operand dtype (bf16 recommended on all gens)

    # ---- Embedding gather + input projection, fused and hoisted off the serial
    #      chain: table_proj rows are already x @ W_ih^T, so one exact one-hot
    #      matmul (f32: 0.0 * v adds are exact) yields xproj for every (b, t).
    ids = ids_ref[...]                                              # (B*T, 1) int32
    iota = lax.broadcasted_iota(jnp.int32, (B * T, V), 1)
    onehot = (iota == ids).astype(jnp.float32)                      # exact row select
    xproj = jnp.dot(onehot, tabp_ref[...],
                    preferred_element_type=jnp.float32)             # (B*T, H) f32
    xproj = xproj + bias_ref[...]                                   # bias folded once
    xproj = xproj.reshape(B, T, H)                                  # batch-major

    whh = whh_ref[...]                                              # (H, H), hoisted load

    # ---- Recurrence: fully unrolled over the small static time axis; h lives in
    #      vregs.  Step 0 has h_0 = 0, so its W_hh dot is skipped entirely.
    h = jnp.tanh(xproj[:, 0, :])                                    # (B, H) f32
    hs_ref[:, 0, :] = h
    for t in range(1, T):
        pre = xproj[:, t, :] + jnp.dot(h.astype(mm_dtype), whh,
                                       preferred_element_type=jnp.float32)
        h = jnp.tanh(pre)                                           # f32 VPU/EUP math
        hs_ref[:, t, :] = h                                         # static VMEM store

    # ---- Output projection hoisted off the recurrence: one matmul + bias, one
    #      batch-major store.  (Reshape is tile-free because T == 8, H <= 128.)
    rec = hs_ref[...].reshape(B * T, H).astype(mm_dtype)
    logits = (jnp.dot(rec, wout_ref[...], preferred_element_type=jnp.float32)
              + bout_ref[...])                                      # (B*T, C) f32
    out_ref[...] = logits.reshape(B, T, C).astype(out_ref.dtype)


def rnn_model_forward(sentence, embedding_table, w_ih, w_hh, b_ih, b_hh,
                      w_out, b_out, *, matmul_dtype=jnp.bfloat16):
    """sentence: (B, T) int32 token ids. Returns logits (B, T, C) float32.

    matmul_dtype: operand dtype for the W_hh / W_out matmuls (bf16 is MXU-native
    on v5e/v6e/v7x; f32 gives exact parity).  Accumulation is always f32, and
    the embedding gather / input projection is exact f32 in both modes.
    """
    B, T = sentence.shape
    V, E = embedding_table.shape
    H = w_ih.shape[0]
    C = w_out.shape[0]

    # Token ids as a (B*T, 1) column; row-major flatten so row b*T + t == sentence[b, t].
    ids = sentence.reshape(B * T, 1).astype(jnp.int32)

    # Pre-fuse embedding with W_ih in the wrapper (exact under the one-hot row
    # select): table_proj[i] == embedding_table[i] @ W_ih^T.  Kept in f32 so the
    # "gather" stays exact even on the bf16 matmul path.
    table_proj = jnp.dot(embedding_table.astype(jnp.float32),
                         jnp.transpose(w_ih).astype(jnp.float32))   # (V, H) f32

    whh_t = jnp.transpose(w_hh).astype(matmul_dtype)                # (H, H)
    bias = (b_ih + b_hh).reshape(1, H).astype(jnp.float32)          # (1, H)
    wout_t = jnp.transpose(w_out).astype(matmul_dtype)              # (H, C)
    bout = b_out.reshape(1, C).astype(jnp.float32)                  # (1, C)

    vmem = pl.BlockSpec(memory_space=pltpu.MemorySpace.VMEM)
    return pl.pallas_call(
        rnn_kernel,
        out_shape=jax.ShapeDtypeStruct((B, T, C), jnp.float32),
        in_specs=[vmem] * 6,
        out_specs=vmem,
        scratch_shapes=[pltpu.VMEM((B, T, H), jnp.float32)],        # staged hidden states
    )(ids, table_proj, whh_t, bias, wout_t, bout)


def rnn_model_reference(sentence, embedding_table, w_ih, w_hh, b_ih, b_hh,
                        w_out, b_out):
    """Pure-JAX reference mirroring torch.nn.RNN(batch_first=True) + Linear."""
    embeds = jnp.take(embedding_table, sentence, axis=0)            # (B, T, E)
    B, T, E = embeds.shape
    H = w_ih.shape[0]

    def step(h, x_t):
        h_new = jnp.tanh(x_t @ w_ih.T + b_ih + h @ w_hh.T + b_hh)
        return h_new, h_new

    x_tbe = jnp.transpose(embeds, (1, 0, 2)).astype(jnp.float32)
    _, hs = jax.lax.scan(step, jnp.zeros((B, H), jnp.float32), x_tbe)
    rec_out = jnp.transpose(hs, (1, 0, 2))                          # (B, T, H)
    return rec_out @ w_out.T + b_out


if __name__ == "__main__":
    # Small, deterministic setup consistent with the module's __init__.
    VOCAB = 50
    EMBEDDING_DIM = 100
    HIDDEN = 32
    NUM_CLASSES = 12
    B, T = 2, 8

    key = jax.random.PRNGKey(0)
    ks = jax.random.split(key, 8)

    # embedding_table = randn((len(vocabulary) + 2, EMBEDDING_DIM)) / 10
    embedding_table = jax.random.normal(ks[0], (VOCAB + 2, EMBEDDING_DIM),
                                        jnp.float32) / 10.0

    # nn.RNN parameters (single layer, unidirectional).
    k_rnn = 1.0 / jnp.sqrt(HIDDEN)
    w_ih = jax.random.uniform(ks[1], (HIDDEN, EMBEDDING_DIM), jnp.float32,
                              -k_rnn, k_rnn)
    w_hh = jax.random.uniform(ks[2], (HIDDEN, HIDDEN), jnp.float32,
                              -k_rnn, k_rnn)
    b_ih = jax.random.uniform(ks[3], (HIDDEN,), jnp.float32, -k_rnn, k_rnn)
    b_hh = jax.random.uniform(ks[4], (HIDDEN,), jnp.float32, -k_rnn, k_rnn)

    # nn.Linear(hidden_size, num_classes)
    k_lin = 1.0 / jnp.sqrt(HIDDEN)
    w_out = jax.random.uniform(ks[5], (NUM_CLASSES, HIDDEN), jnp.float32,
                               -k_lin, k_lin)
    b_out = jax.random.uniform(ks[6], (NUM_CLASSES,), jnp.float32,
                               -k_lin, k_lin)

    # sentence: (B, T) token ids (padding_idx=0 only affects gradients in torch).
    sentence = jax.random.randint(ks[7], (B, T), 0, VOCAB + 2, jnp.int32)

    ref = rnn_model_reference(sentence, embedding_table, w_ih, w_hh,
                              b_ih, b_hh, w_out, b_out)

    # f32 matmul-operand path: exact parity, tight check.
    fwd_f32 = jax.jit(functools.partial(rnn_model_forward,
                                        matmul_dtype=jnp.float32))
    logits = fwd_f32(sentence, embedding_table, w_ih, w_hh, b_ih, b_hh,
                     w_out, b_out)
    jax.block_until_ready(logits)
    assert logits.shape == (B, T, NUM_CLASSES)
    assert jnp.allclose(logits, ref, atol=1e-4, rtol=1e-4), \
        float(jnp.max(jnp.abs(logits - ref)))

    # bf16 matmul-operand path (MXU-native on v5e/v6e/v7x; f32 accumulation,
    # exact f32 embedding/input-projection), loose check.
    fwd_bf16 = jax.jit(functools.partial(rnn_model_forward,
                                         matmul_dtype=jnp.bfloat16))
    logits_bf16 = fwd_bf16(sentence, embedding_table, w_ih, w_hh, b_ih, b_hh,
                           w_out, b_out)
    jax.block_until_ready(logits_bf16)
    assert jnp.allclose(logits_bf16, ref, atol=2e-2, rtol=2e-2), \
        float(jnp.max(jnp.abs(logits_bf16 - ref)))

    print("KERNEL_OK")
</pallas_src>

<mosaic_0001>
module attributes {stable_mosaic.version = 11 : i64} {
  func.func @rnn_kernel(%arg0: memref<16x1xi32, #tpu.memory_space<vmem>>, %arg1: memref<52x32xf32, #tpu.memory_space<vmem>>, %arg2: memref<32x32xf32, #tpu.memory_space<vmem>>, %arg3: memref<1x32xf32, #tpu.memory_space<vmem>>, %arg4: memref<32x12xf32, #tpu.memory_space<vmem>>, %arg5: memref<1x12xf32, #tpu.memory_space<vmem>>, %arg6: memref<2x8x12xf32, #tpu.memory_space<vmem>>, %arg7: memref<2x8x32xf32, #tpu.memory_space<vmem>>) attributes {dimension_semantics = [], scalar_prefetch = 0 : i64, scratch_operands = 1 : i64, tpu.core_type = #tpu.core_type<tc>} {
    %c0 = arith.constant 0 : index
    %c0_0 = arith.constant 0 : index
    %0 = vector.load %arg0[%c0, %c0_0] : memref<16x1xi32, #tpu.memory_space<vmem>>, vector<16x1xi32>
    %1 = tpu.iota {dimensions = array<i32: 1>} : vector<16x52xi32>
    %2 = vector.broadcast %0 : vector<16x1xi32> to vector<16x52xi32>
    %3 = arith.cmpi eq, %1, %2 : vector<16x52xi32>
    %4 = arith.extui %3 : vector<16x52xi1> to vector<16x52xi32>
    %5 = arith.sitofp %4 : vector<16x52xi32> to vector<16x52xf32>
    %c0_1 = arith.constant 0 : index
    %c0_2 = arith.constant 0 : index
    %6 = vector.load %arg1[%c0_1, %c0_2] : memref<52x32xf32, #tpu.memory_space<vmem>>, vector<52x32xf32>
    %cst = arith.constant dense<0.000000e+00> : vector<16x32xf32>
    %7 = tpu.matmul %5, %6, %cst {dimension_numbers = #tpu.dot_dimension_numbers<[1], [0], [0], [1], [0, 0, 1, 1], [], []>} : vector<16x52xf32>, vector<52x32xf32>, vector<16x32xf32> -> vector<16x32xf32>
    %c0_3 = arith.constant 0 : index
    %c0_4 = arith.constant 0 : index
    %8 = vector.load %arg3[%c0_3, %c0_4] : memref<1x32xf32, #tpu.memory_space<vmem>>, vector<1x32xf32>
    %9 = vector.broadcast %8 : vector<1x32xf32> to vector<16x32xf32>
    %10 = arith.addf %7, %9 : vector<16x32xf32>
    %11 = vector.shape_cast %10 : vector<16x32xf32> to vector<2x8x32xf32>
    %c0_5 = arith.constant 0 : index
    %c0_6 = arith.constant 0 : index
    %12 = vector.load %arg2[%c0_5, %c0_6] : memref<32x32xf32, #tpu.memory_space<vmem>>, vector<32x32xf32>
    %13 = vector.extract_strided_slice %11 {offsets = [0, 0, 0], sizes = [2, 1, 32], strides = [1, 1, 1]} : vector<2x8x32xf32> to vector<2x1x32xf32>
    %14 = vector.shape_cast %13 : vector<2x1x32xf32> to vector<2x32xf32>
    %15 = math.tanh %14 : vector<2x32xf32>
    %c0_7 = arith.constant 0 : index
    %c0_8 = arith.constant 0 : index
    %c0_9 = arith.constant 0 : index
    %16 = vector.load %arg7[%c0_7, %c0_8, %c0_9] : memref<2x8x32xf32, #tpu.memory_space<vmem>>, vector<2x1x32xf32>
    %17 = vector.shape_cast %16 : vector<2x1x32xf32> to vector<2x32xf32>
    %18 = vector.shape_cast %15 : vector<2x32xf32> to vector<2x1x32xf32>
    tpu.vector_store %arg7[%c0_7, %c0_8, %c0_9], %18 {strides = array<i32>} : memref<2x8x32xf32, #tpu.memory_space<vmem>>, vector<2x1x32xf32>,
    %19 = vector.extract_strided_slice %11 {offsets = [0, 1, 0], sizes = [2, 1, 32], strides = [1, 1, 1]} : vector<2x8x32xf32> to vector<2x1x32xf32>
    %20 = vector.shape_cast %19 : vector<2x1x32xf32> to vector<2x32xf32>
    %cst_10 = arith.constant dense<0.000000e+00> : vector<2x32xf32>
    %21 = tpu.matmul %15, %12, %cst_10 {dimension_numbers = #tpu.dot_dimension_numbers<[1], [0], [0], [1], [0, 0, 1, 1], [], []>} : vector<2x32xf32>, vector<32x32xf32>, vector<2x32xf32> -> vector<2x32xf32>
    %22 = arith.addf %20, %21 : vector<2x32xf32>
    %23 = math.tanh %22 : vector<2x32xf32>
    %c0_11 = arith.constant 0 : index
    %c1 = arith.constant 1 : index
    %c0_12 = arith.constant 0 : index
    %24 = vector.load %arg7[%c0_11, %c1, %c0_12] : memref<2x8x32xf32, #tpu.memory_space<vmem>>, vector<2x1x32xf32>
    %25 = vector.shape_cast %24 : vector<2x1x32xf32> to vector<2x32xf32>
    %26 = vector.shape_cast %23 : vector<2x32xf32> to vector<2x1x32xf32>
    tpu.vector_store %arg7[%c0_11, %c1, %c0_12], %26 {strides = array<i32>} : memref<2x8x32xf32, #tpu.memory_space<vmem>>, vector<2x1x32xf32>,
    %27 = vector.extract_strided_slice %11 {offsets = [0, 2, 0], sizes = [2, 1, 32], strides = [1, 1, 1]} : vector<2x8x32xf32> to vector<2x1x32xf32>
    %28 = vector.shape_cast %27 : vector<2x1x32xf32> to vector<2x32xf32>
    %cst_13 = arith.constant dense<0.000000e+00> : vector<2x32xf32>
    %29 = tpu.matmul %23, %12, %cst_13 {dimension_numbers = #tpu.dot_dimension_numbers<[1], [0], [0], [1], [0, 0, 1, 1], [], []>} : vector<2x32xf32>, vector<32x32xf32>, vector<2x32xf32> -> vector<2x32xf32>
    %30 = arith.addf %28, %29 : vector<2x32xf32>
    %31 = math.tanh %30 : vector<2x32xf32>
    %c0_14 = arith.constant 0 : index
    %c2 = arith.constant 2 : index
    %c0_15 = arith.constant 0 : index
    %32 = vector.load %arg7[%c0_14, %c2, %c0_15] : memref<2x8x32xf32, #tpu.memory_space<vmem>>, vector<2x1x32xf32>
    %33 = vector.shape_cast %32 : vector<2x1x32xf32> to vector<2x32xf32>
    %34 = vector.shape_cast %31 : vector<2x32xf32> to vector<2x1x32xf32>
    tpu.vector_store %arg7[%c0_14, %c2, %c0_15], %34 {strides = array<i32>} : memref<2x8x32xf32, #tpu.memory_space<vmem>>, vector<2x1x32xf32>,
    %35 = vector.extract_strided_slice %11 {offsets = [0, 3, 0], sizes = [2, 1, 32], strides = [1, 1, 1]} : vector<2x8x32xf32> to vector<2x1x32xf32>
    %36 = vector.shape_cast %35 : vector<2x1x32xf32> to vector<2x32xf32>
    %cst_16 = arith.constant dense<0.000000e+00> : vector<2x32xf32>
    %37 = tpu.matmul %31, %12, %cst_16 {dimension_numbers = #tpu.dot_dimension_numbers<[1], [0], [0], [1], [0, 0, 1, 1], [], []>} : vector<2x32xf32>, vector<32x32xf32>, vector<2x32xf32> -> vector<2x32xf32>
    %38 = arith.addf %36, %37 : vector<2x32xf32>
    %39 = math.tanh %38 : vector<2x32xf32>
    %c0_17 = arith.constant 0 : index
    %c3 = arith.constant 3 : index
    %c0_18 = arith.constant 0 : index
    %40 = vector.load %arg7[%c0_17, %c3, %c0_18] : memref<2x8x32xf32, #tpu.memory_space<vmem>>, vector<2x1x32xf32>
    %41 = vector.shape_cast %40 : vector<2x1x32xf32> to vector<2x32xf32>
    %42 = vector.shape_cast %39 : vector<2x32xf32> to vector<2x1x32xf32>
    tpu.vector_store %arg7[%c0_17, %c3, %c0_18], %42 {strides = array<i32>} : memref<2x8x32xf32, #tpu.memory_space<vmem>>, vector<2x1x32xf32>,
    %43 = vector.extract_strided_slice %11 {offsets = [0, 4, 0], sizes = [2, 1, 32], strides = [1, 1, 1]} : vector<2x8x32xf32> to vector<2x1x32xf32>
    %44 = vector.shape_cast %43 : vector<2x1x32xf32> to vector<2x32xf32>
    %cst_19 = arith.constant dense<0.000000e+00> : vector<2x32xf32>
    %45 = tpu.matmul %39, %12, %cst_19 {dimension_numbers = #tpu.dot_dimension_numbers<[1], [0], [0], [1], [0, 0, 1, 1], [], []>} : vector<2x32xf32>, vector<32x32xf32>, vector<2x32xf32> -> vector<2x32xf32>
    %46 = arith.addf %44, %45 : vector<2x32xf32>
    %47 = math.tanh %46 : vector<2x32xf32>
    %c0_20 = arith.constant 0 : index
    %c4 = arith.constant 4 : index
    %c0_21 = arith.constant 0 : index
    %48 = vector.load %arg7[%c0_20, %c4, %c0_21] : memref<2x8x32xf32, #tpu.memory_space<vmem>>, vector<2x1x32xf32>
    %49 = vector.shape_cast %48 : vector<2x1x32xf32> to vector<2x32xf32>
    %50 = vector.shape_cast %47 : vector<2x32xf32> to vector<2x1x32xf32>
    tpu.vector_store %arg7[%c0_20, %c4, %c0_21], %50 {strides = array<i32>} : memref<2x8x32xf32, #tpu.memory_space<vmem>>, vector<2x1x32xf32>,
    %51 = vector.extract_strided_slice %11 {offsets = [0, 5, 0], sizes = [2, 1, 32], strides = [1, 1, 1]} : vector<2x8x32xf32> to vector<2x1x32xf32>
    %52 = vector.shape_cast %51 : vector<2x1x32xf32> to vector<2x32xf32>
    %cst_22 = arith.constant dense<0.000000e+00> : vector<2x32xf32>
    %53 = tpu.matmul %47, %12, %cst_22 {dimension_numbers = #tpu.dot_dimension_numbers<[1], [0], [0], [1], [0, 0, 1, 1], [], []>} : vector<2x32xf32>, vector<32x32xf32>, vector<2x32xf32> -> vector<2x32xf32>
    %54 = arith.addf %52, %53 : vector<2x32xf32>
    %55 = math.tanh %54 : vector<2x32xf32>
    %c0_23 = arith.constant 0 : index
    %c5 = arith.constant 5 : index
    %c0_24 = arith.constant 0 : index
    %56 = vector.load %arg7[%c0_23, %c5, %c0_24] : memref<2x8x32xf32, #tpu.memory_space<vmem>>, vector<2x1x32xf32>
    %57 = vector.shape_cast %56 : vector<2x1x32xf32> to vector<2x32xf32>
    %58 = vector.shape_cast %55 : vector<2x32xf32> to vector<2x1x32xf32>
    tpu.vector_store %arg7[%c0_23, %c5, %c0_24], %58 {strides = array<i32>} : memref<2x8x32xf32, #tpu.memory_space<vmem>>, vector<2x1x32xf32>,
    %59 = vector.extract_strided_slice %11 {offsets = [0, 6, 0], sizes = [2, 1, 32], strides = [1, 1, 1]} : vector<2x8x32xf32> to vector<2x1x32xf32>
    %60 = vector.shape_cast %59 : vector<2x1x32xf32> to vector<2x32xf32>
    %cst_25 = arith.constant dense<0.000000e+00> : vector<2x32xf32>
    %61 = tpu.matmul %55, %12, %cst_25 {dimension_numbers = #tpu.dot_dimension_numbers<[1], [0], [0], [1], [0, 0, 1, 1], [], []>} : vector<2x32xf32>, vector<32x32xf32>, vector<2x32xf32> -> vector<2x32xf32>
    %62 = arith.addf %60, %61 : vector<2x32xf32>
    %63 = math.tanh %62 : vector<2x32xf32>
    %c0_26 = arith.constant 0 : index
    %c6 = arith.constant 6 : index
    %c0_27 = arith.constant 0 : index
    %64 = vector.load %arg7[%c0_26, %c6, %c0_27] : memref<2x8x32xf32, #tpu.memory_space<vmem>>, vector<2x1x32xf32>
    %65 = vector.shape_cast %64 : vector<2x1x32xf32> to vector<2x32xf32>
    %66 = vector.shape_cast %63 : vector<2x32xf32> to vector<2x1x32xf32>
    tpu.vector_store %arg7[%c0_26, %c6, %c0_27], %66 {strides = array<i32>} : memref<2x8x32xf32, #tpu.memory_space<vmem>>, vector<2x1x32xf32>,
    %67 = vector.extract_strided_slice %11 {offsets = [0, 7, 0], sizes = [2, 1, 32], strides = [1, 1, 1]} : vector<2x8x32xf32> to vector<2x1x32xf32>
    %68 = vector.shape_cast %67 : vector<2x1x32xf32> to vector<2x32xf32>
    %cst_28 = arith.constant dense<0.000000e+00> : vector<2x32xf32>
    %69 = tpu.matmul %63, %12, %cst_28 {dimension_numbers = #tpu.dot_dimension_numbers<[1], [0], [0], [1], [0, 0, 1, 1], [], []>} : vector<2x32xf32>, vector<32x32xf32>, vector<2x32xf32> -> vector<2x32xf32>
    %70 = arith.addf %68, %69 : vector<2x32xf32>
    %71 = math.tanh %70 : vector<2x32xf32>
    %c0_29 = arith.constant 0 : index
    %c7 = arith.constant 7 : index
    %c0_30 = arith.constant 0 : index
    %72 = vector.load %arg7[%c0_29, %c7, %c0_30] : memref<2x8x32xf32, #tpu.memory_space<vmem>>, vector<2x1x32xf32>
    %73 = vector.shape_cast %72 : vector<2x1x32xf32> to vector<2x32xf32>
    %74 = vector.shape_cast %71 : vector<2x32xf32> to vector<2x1x32xf32>
    tpu.vector_store %arg7[%c0_29, %c7, %c0_30], %74 {strides = array<i32>} : memref<2x8x32xf32, #tpu.memory_space<vmem>>, vector<2x1x32xf32>,
    %c0_31 = arith.constant 0 : index
    %c0_32 = arith.constant 0 : index
    %c0_33 = arith.constant 0 : index
    %75 = vector.load %arg7[%c0_31, %c0_32, %c0_33] : memref<2x8x32xf32, #tpu.memory_space<vmem>>, vector<2x8x32xf32>
    %76 = vector.shape_cast %75 : vector<2x8x32xf32> to vector<16x32xf32>
    %c0_34 = arith.constant 0 : index
    %c0_35 = arith.constant 0 : index
    %77 = vector.load %arg4[%c0_34, %c0_35] : memref<32x12xf32, #tpu.memory_space<vmem>>, vector<32x12xf32>
    %cst_36 = arith.constant dense<0.000000e+00> : vector<16x12xf32>
    %78 = tpu.matmul %76, %77, %cst_36 {dimension_numbers = #tpu.dot_dimension_numbers<[1], [0], [0], [1], [0, 0, 1, 1], [], []>} : vector<16x32xf32>, vector<32x12xf32>, vector<16x12xf32> -> vector<16x12xf32>
    %c0_37 = arith.constant 0 : index
    %c0_38 = arith.constant 0 : index
    %79 = vector.load %arg5[%c0_37, %c0_38] : memref<1x12xf32, #tpu.memory_space<vmem>>, vector<1x12xf32>
    %80 = vector.broadcast %79 : vector<1x12xf32> to vector<16x12xf32>
    %81 = arith.addf %78, %80 : vector<16x12xf32>
    %82 = vector.shape_cast %81 : vector<16x12xf32> to vector<2x8x12xf32>
    %c0_39 = arith.constant 0 : index
    %c0_40 = arith.constant 0 : index
    %c0_41 = arith.constant 0 : index
    %83 = vector.load %arg6[%c0_39, %c0_40, %c0_41] : memref<2x8x12xf32, #tpu.memory_space<vmem>>, vector<2x8x12xf32>
    tpu.vector_store %arg6[%c0_39, %c0_40, %c0_41], %82 {strides = array<i32>} : memref<2x8x12xf32, #tpu.memory_space<vmem>>, vector<2x8x12xf32>,
    return
  }
}

</mosaic_0001>

<bundles_post_ra>
// kernel: rnn_model_forward.1
= control target key start
LH: loop header
LB: loop body
LE: loop exit
PB: predicated region body
PF: predicated region fallthrough
CT: control target
= control target key end

     0   :  { %v1181_v2 = vmov 0   ;;  %s1376_s0 = inlined_call_operand.vmem [shape: s32[16,1], index: 0, kind: input, shape index: {}]   ;;  %s1377_s1 = inlined_call_operand.vmem [shape: f32[52,32], index: 1, kind: input, shape index: {}]   ;;  %s1378_s2 = inlined_call_operand.vmem [shape: f32[32,32], index: 2, kind: input, shape index: {}]   ;;  %s1379_s3 = inlined_call_operand.vmem [shape: f32[1,32], index: 3, kind: input, shape index: {}]   ;;  %s1380_s4 = inlined_call_operand.vmem [shape: f32[32,12], index: 4, kind: input, shape index: {}]   ;;  %s1381_s5 = inlined_call_operand.vmem [shape: f32[1,12], index: 5, kind: input, shape index: {}]   ;;  %s1382_s6 = inlined_call_operand.hbm [shape: f32[2,8,12], index: 6, kind: output, shape index: {}]  }
   0x1   :  { %v24_v0 = vld [vmem:[%s1376_s0] sm:$0xff]  ;;  %1124 = vset.pattern.permute.xlu0 %v1181_v2  ;;  %v41_v3 = vld [vmem:[%s1377_s1 + $0x8] sm:$0xff]  ;;  %v42_v4 = vld [vmem:[%s1377_s1 + $0x10] sm:$0xff] }
   0x2   :  { %v40_v1 = vld [vmem:[%s1377_s1] sm:$0xff]  ;;  %v43_v5 = vld [vmem:[%s1377_s1 + $0x18] sm:$0xff]  ;;  %29 = vperm.xlu0 %1124, %v24_v0  }
   0x3   :  { %v1055_v6 = vpack.c.bf16 %v41_v3, %v40_v1  ;;  %v1059_v7 = vpack.c.bf16 %v43_v5, %v42_v4 }
   0x4   :  { %11 = vsyncpa [#allocation4], 0  ;;  %v25_v8 = vld [vmem:[%s1376_s0 + $0x8] sm:$0xff]  ;;  %v44_v9 = vld [vmem:[%s1377_s1 + $0x20] sm:$0xff]  ;;  %vm61_vm0 = vcmask 1043456   ;;  %v26_v13 = vlaneseq  ;;  %vm54_vm1 = vcmask 424960  }
   0x5   :  { %v45_v10 = vld [vmem:[%s1377_s1 + $0x28] sm:$0xff]  ;;  %1056 = vmatprep.subr.bf16.mxu0 %v1055_v6  ;;  %v46_v12 = vld [vmem:[%s1377_s1 + $0x30] sm:$0xf]  ;;  %v1182_v16 = vmov 0.0   ;;  %v140_v20 = vld [vmem:[%s1378_s2] sm:$0xff]  ;;  %v1183_v23 = vmov 0.0|0.0  }
   0x6   :  { %1058 = vmatpush3.bf16.msra.mxu0 %v1055_v6  ;;  %32 = vperm.xlu0 %1124, %v25_v8   ;;  %v1063_v11 = vpack.c.bf16 %v45_v10, %v44_v9  ;;  %v27_v14 = vand.u32 127, %v26_v13  ;;  %v141_v21 = vld [vmem:[%s1378_s2 + $0x8] sm:$0xff]  ;;  %v142_v22 = vld [vmem:[%s1378_s2 + $0x10] sm:$0xff]  ;;  %v143_v25 = vld [vmem:[%s1378_s2 + $0x18] sm:$0xff]  ;;  %vm1184_vm4 = vmmov 0   ;;  %vm146_vm5 = vcmask 253952  }
   0x7   :  { %1060 = vmatprep.subr.bf16.mxu0 %v1059_v7  ;;  %1067 = vmatprep.subr.bf16.mxu1 %v1183_v23  ;;  %v1262_v24 = vpack.c.bf16 %v141_v21, %v140_v20  ;;  %v1273_v26 = vpack.c.bf16 %v143_v25, %v142_v22  ;;  %v886_v27 = vld [vmem:[%s1379_s3] ss:$0 sm:$0xff]  ;;  %vm152_vm6 = vcmask 1041409   ;;  %vm154_vm7 = vcmask 261120   ;;  %s1185_s30 = smov [#allocation3]  }
   0x8   :  { %975 = vmatprep.mubr.msk.f32.mxu1 %vm1184_vm4, %v1182_v16  ;;  %vm235_vm8 = vcmask 254977   ;;  %vm323_vm9 = vcmask 256002   ;;  %vm412_vm10 = vcmask 257027   ;;  %vm501_vm11 = vcmask 258052   ;;  %s873_s7 = sshll.u32 %s1185_s30, 4  ;;  %s874_s7 = int_to_ptr.vmem [resolvable:$true] %s873_s7 }
   0x9   :  { %1069 = vmatpush3.bf16.msra.mxu1 %v1262_v24  ;;  %vm590_vm12 = vcmask 259077   ;;  %vm679_vm13 = vcmask 260102   ;;  %vm768_vm14 = vcmask 261127   ;;  %vm865_vm15 = vcmask 97280   ;;  %s1157_s8 = scalar_lea.vmem %s874_s7, 256  ;;  %p1162_p1 = scmp.lt.s32.totalorder %s874_s7, %s874_s7 }
   0xa   :  { %1062 = vmatpush3.bf16.msra.mxu0 %v1059_v7  ;;  %1070 = vmatprep.subr.bf16.mxu1 %v1183_v23  ;;  %p1158_p0 = scmp.ne.s32.totalorder %s874_s7, %s1157_s8  ;;  %p1163_p2 = scmp.lt.s32.totalorder %s1157_s8, %s1157_s8 }
   0xb   :  { %1064 = vmatprep.subr.bf16.mxu0 %v1063_v11 }
   0xc   :  { %p1164_p3 = por %p1163_p2, %p1162_p1 }
   0xd   :  { %1072 = vmatpush3.bf16.msra.mxu1 %v1273_v26 }
   0xe   :  { %1066 = vmatpush3.bf16.msra.mxu0 %v1063_v11  ;;  %1073 = vmatprep.subr.bf16.mxu1 %v1183_v23  ;;  %p1165_p4 = pnand %p1164_p3, %p1158_p0 }
   0xf   :  { %962 = vmatprep.subr.msk.mxu0 %vm61_vm0, %v46_v12 }
  0x12   :  { %963 = vmatpush3.msk.msra.mxu0 %vm61_vm0, %v46_v12 }
  0x13   :  { %1079 = vmatprep.subr.bf16.mxu0 %v1183_v23 }
  0x81   :  { %v30_v15 = vpop.permute.xlu0 %29 }
  0x82   :  { %vm34_vm2 = vcmp.eq.s32.totalorder %v27_v14, %v30_v15 }
  0x83   :  { %v884_v17 = vsel %vm34_vm2, 1.0, %v1182_v16 }
  0x84   :  { %964 = vmatprep.mubr.msk.f32.mxu0 %vm54_vm1, %v884_v17 }
  0x85   :  { %v33_v18 = vpop.permute.xlu0 %32 }
  0x86   :  { %vm35_vm3 = vcmp.eq.s32.totalorder %v27_v14, %v33_v18 }
  0x87   :  { %v885_v19 = vsel %vm35_vm3, 1.0, %v1182_v16 }
  0x88   :  { %965 = vmatmul.mubr.msk.f32.vlgmr.msra.gmra.mrb[0].mxu0 %vm54_vm1, %v885_v19 }
  0x89   :  { %997 = vmatprep.mubr.msk.f32.mxu0 %vm1184_vm4, %v1182_v16  ;;  %1081 = vmatpush3.bf16.msra.mxu0 %v1262_v24 }
  0x8a   :  { %1082 = vmatprep.subr.bf16.mxu0 %v1183_v23 }
  0x8d   :  { %1084 = vmatpush3.bf16.msra.mxu0 %v1273_v26 }
  0x8e   :  { %1091 = vmatprep.subr.bf16.mxu0 %v1183_v23 }
 0x15b   :  { %v966_v28 = vpop.f32.mrb[0].mxu0 }
 0x15c   :  { %v1285_v29 = vadd.f32 %v966_v28, %v886_v27  ;;  %v131_v30 = vpop.f32.mrb[1].mxu0 }
 0x15d   :  { %v1287_v31 = vadd.f32 %v886_v27, %v131_v30 }
 0x15e   :  { %1125 = vtanh.f32 %v1285_v29 }
 0x15f   :  { %1127 = vtanh.f32 %v1287_v31 }
 0x168   :  { %v1126_v32 = vpop.eup %1125 }
 0x169   :  { %v1128_v33 = vpop.eup %1127  ;;  %148 = vst.msk [vmem:[#allocation2 + $0x8] sm:$0x1] %vm146_vm5, %v1126_v32  ;;  %v151_v34 = vrot.slane %v1126_v32, 7 }
 0x16a   :  { %147 = vst.msk [vmem:[#allocation2] sm:$0x1] %vm146_vm5, %v1128_v33 }
 0x16b   :  { %v153_v35 = vsel %vm152_vm6, %v151_v34, %v1128_v33 }
 0x16c   :  { %976 = vmatmul.mubr.msk.f32.vlgmr.msra.gmra.mrb[0].mxu1 %vm154_vm7, %v153_v35 }
 0x16d   :  { %1075 = vmatpush3.bf16.msra.mxu1 %v1262_v24  ;;  %986 = vmatprep.mubr.msk.f32.mxu1 %vm1184_vm4, %v1182_v16 }
 0x16e   :  { %1076 = vmatprep.subr.bf16.mxu1 %v1183_v23 }
 0x171   :  { %1078 = vmatpush3.bf16.msra.mxu1 %v1273_v26 }
 0x172   :  { %1085 = vmatprep.subr.bf16.mxu1 %v1183_v23 }
 0x23f   :  { %v223_v36 = vpop.f32.mrb[0].mxu1 }
 0x240   :  { %v228_v37 = vrot.slane %v223_v36, 7  ;;  %v232_v38 = vadd.f32 %v223_v36, %v1285_v29  ;;  %v977_v39 = vpop.f32.mrb[1].mxu1 }
 0x241   :  { %v774_v39 = vld [vmem:[%s1380_s4 + $0x8] sm:$0xff] }
 0x242   :  { %v231_v40 = vadd.f32 %v228_v37, %v1287_v31  ;;  %1129 = vtanh.f32 %v232_v38  ;;  %v773_v38 = vld [vmem:[%s1380_s4] sm:$0xff] }
 0x244   :  { %1131 = vtanh.f32 %v231_v40  ;;  %v1109_v40 = vpack.c.bf16 %v774_v39, %v773_v38 }
 0x24c   :  { %v1130_v41 = vpop.eup %1129 }
 0x24d   :  { %237 = vst.msk [vmem:[#allocation2 + $0x8] sm:$0x2] %vm235_vm8, %v1130_v41 }
 0x24e   :  { %v1132_v42 = vpop.eup %1131 }
 0x24f   :  { %236 = vst.msk [vmem:[#allocation2] sm:$0x2] %vm235_vm8, %v1132_v42  ;;  %v240_v43 = vrot.slane %v1132_v42, 1  ;;  %v776_v42 = vld [vmem:[%s1380_s4 + $0x18] sm:$0xff] }
 0x251   :  { %v241_v44 = vsel %vm152_vm6, %v1130_v41, %v240_v43  ;;  %v775_v41 = vld [vmem:[%s1380_s4 + $0x10] sm:$0xff] }
 0x252   :  { %987 = vmatmul.mubr.msk.f32.vlgmr.msra.gmra.mrb[2].mxu1 %vm154_vm7, %v241_v44  ;;  %v1113_v43 = vpack.c.bf16 %v776_v42, %v775_v41 }
 0x253   :  { %1087 = vmatpush3.bf16.msra.mxu1 %v1262_v24  ;;  %1008 = vmatprep.mubr.msk.f32.mxu1 %vm1184_vm4, %v1182_v16 }
 0x254   :  { %1088 = vmatprep.subr.bf16.mxu1 %v1183_v23 }
 0x257   :  { %1090 = vmatpush3.bf16.msra.mxu1 %v1273_v26 }
 0x258   :  { %1097 = vmatprep.subr.bf16.mxu1 %v1183_v23 }
 0x325   :  { %v310_v45 = vpop.f32.mrb[2].mxu1 }
 0x326   :  { %v315_v46 = vrot.slane %v310_v45, 6  ;;  %v316_v47 = vrot.slane %v310_v45, 7  ;;  %v988_v48 = vpop.f32.mrb[3].mxu1 }
 0x328   :  { %v319_v49 = vadd.f32 %v315_v46, %v1287_v31  ;;  %v320_v50 = vadd.f32 %v316_v47, %v1285_v29 }
 0x32a   :  { %1133 = vtanh.f32 %v319_v49 }
 0x32b   :  { %1135 = vtanh.f32 %v320_v50 }
 0x334   :  { %v1134_v51 = vpop.eup %1133 }
 0x335   :  { %v1136_v52 = vpop.eup %1135  ;;  %324 = vst.msk [vmem:[#allocation2] sm:$0x4] %vm323_vm9, %v1134_v51  ;;  %v328_v53 = vrot.slane %v1134_v51, 2 }
 0x336   :  { %325 = vst.msk [vmem:[#allocation2 + $0x8] sm:$0x4] %vm323_vm9, %v1136_v52  ;;  %v329_v54 = vrot.slane %v1136_v52, 1 }
 0x338   :  { %v330_v55 = vsel %vm152_vm6, %v329_v54, %v328_v53  ;;  %v897_v54 = vld [vmem:[%s1381_s5] ss:$0 sm:$0xff] }
 0x339   :  { %998 = vmatmul.mubr.msk.f32.vlgmr.msra.gmra.mrb[2].mxu0 %vm154_vm7, %v330_v55 }
 0x33a   :  { %1093 = vmatpush3.bf16.msra.mxu0 %v1262_v24  ;;  %1019 = vmatprep.mubr.msk.f32.mxu0 %vm1184_vm4, %v1182_v16 }
 0x33b   :  { %1094 = vmatprep.subr.bf16.mxu0 %v1183_v23 }
 0x33e   :  { %1096 = vmatpush3.bf16.msra.mxu0 %v1273_v26 }
 0x33f   :  { %1103 = vmatprep.subr.bf16.mxu0 %v1183_v23 }
 0x40c   :  { %v399_v56 = vpop.f32.mrb[2].mxu0 }
 0x40d   :  { %v404_v57 = vrot.slane %v399_v56, 5  ;;  %v405_v58 = vrot.slane %v399_v56, 6  ;;  %v999_v59 = vpop.f32.mrb[3].mxu0 }
 0x40f   :  { %v408_v60 = vadd.f32 %v404_v57, %v1287_v31  ;;  %v409_v61 = vadd.f32 %v405_v58, %v1285_v29 }
 0x411   :  { %1137 = vtanh.f32 %v408_v60 }
 0x412   :  { %1139 = vtanh.f32 %v409_v61 }
 0x41b   :  { %v1138_v62 = vpop.eup %1137 }
 0x41c   :  { %v1140_v63 = vpop.eup %1139  ;;  %413 = vst.msk [vmem:[#allocation2] sm:$0x8] %vm412_vm10, %v1138_v62  ;;  %v417_v0 = vrot.slane %v1138_v62, 3 }
 0x41d   :  { %414 = vst.msk [vmem:[#allocation2 + $0x8] sm:$0x8] %vm412_vm10, %v1140_v63  ;;  %v418_v1 = vrot.slane %v1140_v63, 2 }
 0x41f   :  { %v419_v2 = vsel %vm152_vm6, %v418_v1, %v417_v0 }
 0x420   :  { %1009 = vmatmul.mubr.msk.f32.vlgmr.msra.gmra.mrb[4].mxu1 %vm154_vm7, %v419_v2 }
 0x421   :  { %1099 = vmatpush3.bf16.msra.mxu1 %v1262_v24  ;;  %1030 = vmatprep.mubr.msk.f32.mxu1 %vm1184_vm4, %v1182_v16 }
 0x422   :  { %1100 = vmatprep.subr.bf16.mxu1 %v1183_v23 }
 0x425   :  { %1102 = vmatpush3.bf16.msra.mxu1 %v1273_v26 }
 0x426   :  { %1110 = vmatprep.subr.bf16.mxu1 %v1109_v40 }
 0x4f3   :  { %v488_v3 = vpop.f32.mrb[4].mxu1 }
 0x4f4   :  { %v493_v4 = vrot.slane %v488_v3, 4  ;;  %v494_v5 = vrot.slane %v488_v3, 5  ;;  %v1010_v6 = vpop.f32.mrb[5].mxu1 }
 0x4f6   :  { %v497_v7 = vadd.f32 %v493_v4, %v1287_v31  ;;  %v498_v8 = vadd.f32 %v494_v5, %v1285_v29 }
 0x4f8   :  { %1141 = vtanh.f32 %v497_v7 }
 0x4f9   :  { %1143 = vtanh.f32 %v498_v8 }
 0x502   :  { %v1142_v9 = vpop.eup %1141 }
 0x503   :  { %v1144_v10 = vpop.eup %1143  ;;  %502 = vst.msk [vmem:[#allocation2] sm:$0x10] %vm501_vm11, %v1142_v9  ;;  %v506_v11 = vrot.slane %v1142_v9, 4 }
 0x504   :  { %503 = vst.msk [vmem:[#allocation2 + $0x8] sm:$0x10] %vm501_vm11, %v1144_v10  ;;  %v507_v12 = vrot.slane %v1144_v10, 3 }
 0x506   :  { %v508_v13 = vsel %vm152_vm6, %v507_v12, %v506_v11 }
 0x507   :  { %1020 = vmatmul.mubr.msk.f32.vlgmr.msra.gmra.mrb[4].mxu0 %vm154_vm7, %v508_v13 }
 0x508   :  { %1105 = vmatpush3.bf16.msra.mxu0 %v1262_v24  ;;  %1041 = vmatprep.mubr.msk.f32.mxu0 %vm1184_vm4, %v1182_v16 }
 0x509   :  { %1106 = vmatprep.subr.bf16.mxu0 %v1183_v23 }
 0x50c   :  { %1108 = vmatpush3.bf16.msra.mxu0 %v1273_v26 }
 0x5da   :  { %v577_v14 = vpop.f32.mrb[4].mxu0 }
 0x5db   :  { %v582_v15 = vrot.slane %v577_v14, 3  ;;  %v583_v17 = vrot.slane %v577_v14, 4  ;;  %v1021_v18 = vpop.f32.mrb[5].mxu0 }
 0x5dd   :  { %v586_v19 = vadd.f32 %v582_v15, %v1287_v31  ;;  %v587_v20 = vadd.f32 %v583_v17, %v1285_v29 }
 0x5df   :  { %1145 = vtanh.f32 %v586_v19 }
 0x5e0   :  { %1147 = vtanh.f32 %v587_v20 }
 0x5e9   :  { %v1146_v21 = vpop.eup %1145 }
 0x5ea   :  { %v1148_v22 = vpop.eup %1147  ;;  %591 = vst.msk [vmem:[#allocation2] sm:$0x20] %vm590_vm12, %v1146_v21  ;;  %v595_v24 = vrot.slane %v1146_v21, 5 }
 0x5eb   :  { %592 = vst.msk [vmem:[#allocation2 + $0x8] sm:$0x20] %vm590_vm12, %v1148_v22  ;;  %v596_v16 = vrot.slane %v1148_v22, 4 }
 0x5ed   :  { %v597_v23 = vsel %vm152_vm6, %v596_v16, %v595_v24 }
 0x5ee   :  { %1031 = vmatmul.mubr.msk.f32.vlgmr.msra.gmra.mrb[6].mxu1 %vm154_vm7, %v597_v23 }
 0x5ef   :  { %1112 = vmatpush3.bf16.msra.mxu1 %v1109_v40 }
 0x5f0   :  { %1114 = vmatprep.subr.bf16.mxu1 %v1113_v43 }
 0x5f3   :  { %1116 = vmatpush3.bf16.msra.mxu1 %v1113_v43 }
 0x6c1   :  { %v666_v25 = vpop.f32.mrb[6].mxu1 }
 0x6c2   :  { %v671_v26 = vrot.slane %v666_v25, 2  ;;  %v672_v27 = vrot.slane %v666_v25, 3  ;;  %v1032_v28 = vpop.f32.mrb[7].mxu1 }
 0x6c4   :  { %v675_v30 = vadd.f32 %v671_v26, %v1287_v31  ;;  %v676_v32 = vadd.f32 %v672_v27, %v1285_v29 }
 0x6c6   :  { %1149 = vtanh.f32 %v675_v30 }
 0x6c7   :  { %1151 = vtanh.f32 %v676_v32 }
 0x6d0   :  { %v1150_v33 = vpop.eup %1149 }
 0x6d1   :  { %v1152_v34 = vpop.eup %1151  ;;  %680 = vst.msk [vmem:[#allocation2] sm:$0x40] %vm679_vm13, %v1150_v33  ;;  %v684_v35 = vrot.slane %v1150_v33, 6 }
 0x6d2   :  { %681 = vst.msk [vmem:[#allocation2 + $0x8] sm:$0x40] %vm679_vm13, %v1152_v34  ;;  %v685_v36 = vrot.slane %v1152_v34, 5 }
 0x6d4   :  { %v686_v37 = vsel %vm152_vm6, %v685_v36, %v684_v35 }
 0x6d5   :  { %1042 = vmatmul.mubr.msk.f32.vlgmr.msra.gmra.mrb[6].mxu0 %vm154_vm7, %v686_v37 }
 0x7a8   :  { %v755_v44 = vpop.f32.mrb[6].mxu0 }
 0x7a9   :  { %v760_v45 = vrot.slane %v755_v44, 1  ;;  %v761_v46 = vrot.slane %v755_v44, 2  ;;  %v1043_v47 = vpop.f32.mrb[7].mxu0 }
 0x7ab   :  { %v764_v48 = vadd.f32 %v760_v45, %v1287_v31  ;;  %v765_v49 = vadd.f32 %v761_v46, %v1285_v29 }
 0x7ad   :  { %1153 = vtanh.f32 %v764_v48 }
 0x7ae   :  { %1155 = vtanh.f32 %v765_v49 }
 0x7b7   :  { %v1154_v50 = vpop.eup %1153 }
 0x7b8   :  { %v1156_v51 = vpop.eup %1155  ;;  %769 = vst.msk [vmem:[#allocation2] sm:$0x80] %vm768_vm14, %v1154_v50 }
 0x7b9   :  { %770 = vst.msk [vmem:[#allocation2 + $0x8] sm:$0x80] %vm768_vm14, %v1156_v51 }
 0x7bf   :  { %v771_v52 = vld [vmem:[#allocation2] sm:$0xff] }
 0x7c0   :  { %1052 = vmatprep.mubr.msk.f32.mxu1 %vm154_vm7, %v771_v52  ;;  %v772_v53 = vld [vmem:[#allocation2 + $0x8] sm:$0xff] }
 0x7c1   :  { %1053 = vmatmul.mubr.msk.f32.vlgmr.msra.gmra.mrb[8].mxu1 %vm154_vm7, %v772_v53 }
 0x894   :  { %v1054_v29 = vpop.f32.mrb[8].mxu1 }
 0x895   :  { %v862_v31 = vadd.f32 %v1054_v29, %v897_v54  ;;  %v856_v55 = vpop.f32.mrb[9].mxu1 }
 0x896   :  { %v857_v56 = vadd.f32 %v897_v54, %v856_v55 }
 0x897   :  { %867 = vst.msk [vmem:[#allocation3 + $0x8] sm:$0xff] %vm865_vm15, %v862_v31 }
 0x898   :  { %866 = vst.msk [vmem:[#allocation3] sm:$0xff] %vm865_vm15, %v857_v56 }
 0x899   :  { %1168 = shalt.err (!%p1165_p4)
}
 0x89a   :  { %s1169_s5 = scalar_lea.hbm %s1382_s6, 256 }
 0x89b   :  { %p1170_p5 = scmp.ne.s32.totalorder %s1382_s6, %s1169_s5  ;;  %p1173_p6 = scmp.lt.u32.totalorder %s1169_s5, %s1382_s6 }
 0x89d   :  { %p1175_p7 = pnand %p1173_p6, %p1170_p5 }
 0x89f   :  { %1178 = shalt.err (!%p1175_p7)
}
 0x8a0   :  { %s1186_s0 = smov 128   ;;  %s1187_s1 = smov 8  }
 0x8a1   :  { %879 = dma.vmem_to_hbm [thread:$0]  %s874_s7, 256, %s1382_s6, [#allocation4], %s1186_s0, %s1186_s0, %s1187_s1  }
 0x8a2   :  { %1179 = dma.done.wait [#allocation4], 256  }
 0x8a3   :  { %1180 = vsyncadd [#allocation4], 4294967040 }
 0x8a4   :  { %883 = vsyncpa [#allocation4], 1 }

</bundles_post_ra>
